<compile_context>
chip_gen: v6e
topology: v6e:2x2x1
jax: 0.10.0
libtpu: 0.0.40
codegen_flags: <defaults>
</compile_context>

<pallas_src>
import functools
import math

import jax
import jax.numpy as jnp
from jax.experimental import pallas as pl
from jax.experimental.pallas import tpu as pltpu


def pg_forward_kernel(xT_ref, zT_ref, w1T_ref, b1_ref, w2T_ref, b2_ref,
                      w3vT_ref, b3v_ref, probs_ref):
    # Transposed 3-layer MLP: bf16 MXU operands, f32 accumulation/elementwise.
    xT = xT_ref[...].astype(jnp.bfloat16)                       # (S, TB)
    h1 = jnp.maximum(
        jnp.dot(w1T_ref[...], xT, preferred_element_type=jnp.float32)
        + b1_ref[...], 0.0)                                     # (128, TB)
    h2 = jnp.maximum(
        jnp.dot(w2T_ref[...], h1.astype(jnp.bfloat16),
                preferred_element_type=jnp.float32) + b2_ref[...], 0.0)  # (64, TB)
    # Only the variance half of layer 3 survives the pdf algebra.
    out_v = jnp.dot(w3vT_ref[...], h2.astype(jnp.bfloat16),
                    preferred_element_type=jnp.float32) + b3v_ref[...]   # (2, TB)
    var = jnp.maximum(out_v, 0.0) + 0.1                         # ReLU(out[:,2:])+0.1

    # a = mean + sqrt(var) * z  =>  (a-mean)^T cov^-1 (a-mean) = z0^2 + z1^2.
    z = zT_ref[...]                                             # (2, TB)
    quad = z[0:1, :] * z[0:1, :] + z[1:2, :] * z[1:2, :]        # (1, TB), pure VPU
    det = var[0:1, :] * var[1:2, :]                             # det of diag cov
    probs_ref[...] = ((1.0 / (2.0 * math.pi))
                      * jax.lax.rsqrt(det)                      # EUP slot
                      * jnp.exp(-0.5 * quad))                   # lane-dense store


@functools.partial(jax.jit, static_argnames=("block_b",))
def pg_forward(x, z, params, *, block_b=2048):
    """x: (B, state_dim) f32, z: (B, 2) standard-normal noise. Returns (B,) probs."""
    w1, b1, w2, b2, w3, b3 = params
    B, state_dim = x.shape
    h1d, h2d = w1.shape[1], w2.shape[1]

    # Batch tile: multiple of 128 (lane dim), large to amortize per-step overhead,
    # but keep >= 2 grid steps when the batch allows (v7x: 2 TensorCores).
    tb = max(128, (block_b // 128) * 128)
    while tb > 128 and pl.cdiv(B, tb) < 2:
        tb //= 2
    bp = pl.cdiv(B, tb) * tb
    if bp != B:                                   # pad batch to a tile multiple
        x = jnp.pad(x, ((0, bp - B), (0, 0)))     # var >= 0.1 keeps pad rows safe
        z = jnp.pad(z, ((0, bp - B), (0, 0)))

    # Batch-in-lanes layout: features on sublanes, batch on lanes.
    xT = x.T                                      # (state_dim, bp)
    zT = z.T                                      # (2, bp)
    w1T = w1.T.astype(jnp.bfloat16)               # (128, state_dim)
    w2T = w2.T.astype(jnp.bfloat16)               # (64, 128)
    w3vT = w3[:, 2:4].T.astype(jnp.bfloat16)      # (2, 64)  var half only
    b1c = b1.reshape(-1, 1)                       # (128, 1)
    b2c = b2.reshape(-1, 1)                       # (64, 1)
    b3vc = b3[2:4].reshape(-1, 1)                 # (2, 1)

    def stream_spec(rows):                        # blocked over batch lanes
        return pl.BlockSpec((rows, tb), lambda i: (0, i))

    def const_spec(shape):                        # VMEM-resident across grid
        return pl.BlockSpec(shape, lambda i: (0, 0))

    probs = pl.pallas_call(
        pg_forward_kernel,
        out_shape=jax.ShapeDtypeStruct((1, bp), jnp.float32),
        grid=(bp // tb,),
        in_specs=[
            stream_spec(state_dim),               # x^T
            stream_spec(2),                       # z^T
            const_spec((h1d, state_dim)),         # w1^T
            const_spec((h1d, 1)),                 # b1
            const_spec((h2d, h1d)),               # w2^T
            const_spec((h2d, 1)),                 # b2
            const_spec((2, h2d)),                 # w3^T (var half)
            const_spec((2, 1)),                   # b3   (var half)
        ],
        out_specs=stream_spec(1),                 # lane-dense (1, TB) output
        compiler_params=pltpu.CompilerParams(
            dimension_semantics=("parallel",),
            vmem_limit_bytes=32 * 1024 * 1024),
    )(xT, zT, w1T, b1c, w2T, b2c, w3vT, b3vc)
    return probs[0, :B]


def init_linear(key, fan_in, fan_out):
    # Mimic torch.nn.Linear default init: U(-1/sqrt(fan_in), 1/sqrt(fan_in))
    kw, kb = jax.random.split(key)
    bound = 1.0 / math.sqrt(fan_in)
    w = jax.random.uniform(kw, (fan_in, fan_out), jnp.float32, -bound, bound)
    b = jax.random.uniform(kb, (fan_out,), jnp.float32, -bound, bound)
    return w, b


if __name__ == "__main__":
    key = jax.random.PRNGKey(0)
    state_dim, n_actions, batch = 8, 2, 512    # n_actions=2 implied by out[:,0:2]/out[:,2:]
    k1, k2, k3, kx, kz = jax.random.split(key, 5)

    w1, b1 = init_linear(k1, state_dim, 128)
    w2, b2 = init_linear(k2, 128, 64)
    w3, b3 = init_linear(k3, 64, n_actions * 2)
    params = (w1, b1, w2, b2, w3, b3)

    x = jax.random.normal(kx, (batch, state_dim), jnp.float32)
    # TODO(synk): torch samples inside forward via torch.distributions; here the
    # standard-normal noise z is drawn deterministically outside and the sample
    # is a = mean + sqrt(var) * z (reparameterization).
    z = jax.random.normal(kz, (batch, n_actions), jnp.float32)

    probs = jax.block_until_ready(pg_forward(x, z, params))

    # Pure-JAX reference of the same forward pass (matching bf16 matmul inputs),
    # written in the original un-simplified mean/var/a/diff form.
    w1b, w2b, w3b = (w.astype(jnp.bfloat16) for w in (w1, w2, w3))
    h1 = jnp.maximum(jnp.dot(x.astype(jnp.bfloat16), w1b,
                             preferred_element_type=jnp.float32) + b1, 0.0)
    h2 = jnp.maximum(jnp.dot(h1.astype(jnp.bfloat16), w2b,
                             preferred_element_type=jnp.float32) + b2, 0.0)
    out = jnp.dot(h2.astype(jnp.bfloat16), w3b,
                  preferred_element_type=jnp.float32) + b3
    mean = out[:, 0:2]
    var = jnp.maximum(out[:, 2:4], 0.0) + 0.1
    a = mean + jnp.sqrt(var) * z
    d = a - mean
    quad = jnp.sum(d * d / var, axis=1)
    det = var[:, 0] * var[:, 1]
    ref = (1.0 / (2.0 * math.pi)) * jax.lax.rsqrt(det) * jnp.exp(-0.5 * quad)

    assert probs.shape == (batch,)
    assert jnp.allclose(probs, ref, rtol=1e-2, atol=1e-5), (probs, ref)
    print("KERNEL_OK")
</pallas_src>

<mosaic_0001>
module attributes {stable_mosaic.version = 11 : i64} {
  func.func @pg_forward_kernel(%arg0: i32, %arg1: memref<8x256xf32, #tpu.memory_space<vmem>>, %arg2: memref<2x256xf32, #tpu.memory_space<vmem>>, %arg3: memref<128x8xbf16, #tpu.memory_space<vmem>>, %arg4: memref<128x1xf32, #tpu.memory_space<vmem>>, %arg5: memref<64x128xbf16, #tpu.memory_space<vmem>>, %arg6: memref<64x1xf32, #tpu.memory_space<vmem>>, %arg7: memref<2x64xbf16, #tpu.memory_space<vmem>>, %arg8: memref<2x1xf32, #tpu.memory_space<vmem>>, %arg9: memref<1x256xf32, #tpu.memory_space<vmem>>) attributes {dimension_semantics = [#tpu.dimension_semantics<parallel>], iteration_bounds = array<i64: 2>, scalar_prefetch = 0 : i64, scratch_operands = 0 : i64, tpu.core_type = #tpu.core_type<tc>, window_params = [{transform_indices = @transform_0, window_bounds = array<i64: 8, 256>}, {transform_indices = @transform_1, window_bounds = array<i64: 2, 256>}, {pipeline_mode = #tpu.pipeline_mode<synchronous>, transform_indices = @transform_2, window_bounds = array<i64: 128, 8>}, {pipeline_mode = #tpu.pipeline_mode<synchronous>, transform_indices = @transform_3, window_bounds = array<i64: 128, 1>}, {pipeline_mode = #tpu.pipeline_mode<synchronous>, transform_indices = @transform_4, window_bounds = array<i64: 64, 128>}, {pipeline_mode = #tpu.pipeline_mode<synchronous>, transform_indices = @transform_5, window_bounds = array<i64: 64, 1>}, {pipeline_mode = #tpu.pipeline_mode<synchronous>, transform_indices = @transform_6, window_bounds = array<i64: 2, 64>}, {pipeline_mode = #tpu.pipeline_mode<synchronous>, transform_indices = @transform_7, window_bounds = array<i64: 2, 1>}, {transform_indices = @transform_8, window_bounds = array<i64: 1, 256>}]} {
    %c0 = arith.constant 0 : index
    %c0_0 = arith.constant 0 : index
    %0 = vector.load %arg1[%c0, %c0_0] : memref<8x256xf32, #tpu.memory_space<vmem>>, vector<8x256xf32>
    %1 = arith.truncf %0 : vector<8x256xf32> to vector<8x256xbf16>
    %c0_1 = arith.constant 0 : index
    %c0_2 = arith.constant 0 : index
    %2 = vector.load %arg3[%c0_1, %c0_2] : memref<128x8xbf16, #tpu.memory_space<vmem>>, vector<128x8xbf16>
    %cst = arith.constant dense<0.000000e+00> : vector<128x256xf32>
    %3 = tpu.matmul %2, %1, %cst {dimension_numbers = #tpu.dot_dimension_numbers<[1], [0], [0], [1], [0, 0, 1, 1], [], []>} : vector<128x8xbf16>, vector<8x256xbf16>, vector<128x256xf32> -> vector<128x256xf32>
    %c0_3 = arith.constant 0 : index
    %c0_4 = arith.constant 0 : index
    %4 = vector.load %arg4[%c0_3, %c0_4] : memref<128x1xf32, #tpu.memory_space<vmem>>, vector<128x1xf32>
    %5 = vector.broadcast %4 : vector<128x1xf32> to vector<128x256xf32>
    %6 = arith.addf %3, %5 : vector<128x256xf32>
    %cst_5 = arith.constant 0.000000e+00 : f32
    %7 = vector.broadcast %cst_5 : f32 to vector<128x256xf32>
    %8 = arith.maximumf %6, %7 : vector<128x256xf32>
    %c0_6 = arith.constant 0 : index
    %c0_7 = arith.constant 0 : index
    %9 = vector.load %arg5[%c0_6, %c0_7] : memref<64x128xbf16, #tpu.memory_space<vmem>>, vector<64x128xbf16>
    %10 = arith.truncf %8 : vector<128x256xf32> to vector<128x256xbf16>
    %cst_8 = arith.constant dense<0.000000e+00> : vector<64x256xf32>
    %11 = tpu.matmul %9, %10, %cst_8 {dimension_numbers = #tpu.dot_dimension_numbers<[1], [0], [0], [1], [0, 0, 1, 1], [], []>} : vector<64x128xbf16>, vector<128x256xbf16>, vector<64x256xf32> -> vector<64x256xf32>
    %c0_9 = arith.constant 0 : index
    %c0_10 = arith.constant 0 : index
    %12 = vector.load %arg6[%c0_9, %c0_10] : memref<64x1xf32, #tpu.memory_space<vmem>>, vector<64x1xf32>
    %13 = vector.broadcast %12 : vector<64x1xf32> to vector<64x256xf32>
    %14 = arith.addf %11, %13 : vector<64x256xf32>
    %cst_11 = arith.constant 0.000000e+00 : f32
    %15 = vector.broadcast %cst_11 : f32 to vector<64x256xf32>
    %16 = arith.maximumf %14, %15 : vector<64x256xf32>
    %c0_12 = arith.constant 0 : index
    %c0_13 = arith.constant 0 : index
    %17 = vector.load %arg7[%c0_12, %c0_13] : memref<2x64xbf16, #tpu.memory_space<vmem>>, vector<2x64xbf16>
    %18 = arith.truncf %16 : vector<64x256xf32> to vector<64x256xbf16>
    %cst_14 = arith.constant dense<0.000000e+00> : vector<2x256xf32>
    %19 = tpu.matmul %17, %18, %cst_14 {dimension_numbers = #tpu.dot_dimension_numbers<[1], [0], [0], [1], [0, 0, 1, 1], [], []>} : vector<2x64xbf16>, vector<64x256xbf16>, vector<2x256xf32> -> vector<2x256xf32>
    %c0_15 = arith.constant 0 : index
    %c0_16 = arith.constant 0 : index
    %20 = vector.load %arg8[%c0_15, %c0_16] : memref<2x1xf32, #tpu.memory_space<vmem>>, vector<2x1xf32>
    %21 = vector.broadcast %20 : vector<2x1xf32> to vector<2x256xf32>
    %22 = arith.addf %19, %21 : vector<2x256xf32>
    %cst_17 = arith.constant 0.000000e+00 : f32
    %23 = vector.broadcast %cst_17 : f32 to vector<2x256xf32>
    %24 = arith.maximumf %22, %23 : vector<2x256xf32>
    %cst_18 = arith.constant 1.000000e-01 : f32
    %25 = vector.broadcast %cst_18 : f32 to vector<2x256xf32>
    %26 = arith.addf %24, %25 : vector<2x256xf32>
    %c0_19 = arith.constant 0 : index
    %c0_20 = arith.constant 0 : index
    %27 = vector.load %arg2[%c0_19, %c0_20] : memref<2x256xf32, #tpu.memory_space<vmem>>, vector<2x256xf32>
    %28 = vector.extract_strided_slice %27 {offsets = [0, 0], sizes = [1, 256], strides = [1, 1]} : vector<2x256xf32> to vector<1x256xf32>
    %29 = vector.extract_strided_slice %27 {offsets = [0, 0], sizes = [1, 256], strides = [1, 1]} : vector<2x256xf32> to vector<1x256xf32>
    %30 = arith.mulf %28, %29 : vector<1x256xf32>
    %31 = vector.extract_strided_slice %27 {offsets = [1, 0], sizes = [1, 256], strides = [1, 1]} : vector<2x256xf32> to vector<1x256xf32>
    %32 = vector.extract_strided_slice %27 {offsets = [1, 0], sizes = [1, 256], strides = [1, 1]} : vector<2x256xf32> to vector<1x256xf32>
    %33 = arith.mulf %31, %32 : vector<1x256xf32>
    %34 = arith.addf %30, %33 : vector<1x256xf32>
    %35 = vector.extract_strided_slice %26 {offsets = [0, 0], sizes = [1, 256], strides = [1, 1]} : vector<2x256xf32> to vector<1x256xf32>
    %36 = vector.extract_strided_slice %26 {offsets = [1, 0], sizes = [1, 256], strides = [1, 1]} : vector<2x256xf32> to vector<1x256xf32>
    %37 = arith.mulf %35, %36 : vector<1x256xf32>
    %38 = math.rsqrt %37 : vector<1x256xf32>
    %cst_21 = arith.constant 0.159154937 : f32
    %39 = vector.broadcast %cst_21 : f32 to vector<1x256xf32>
    %40 = arith.mulf %39, %38 : vector<1x256xf32>
    %cst_22 = arith.constant -5.000000e-01 : f32
    %41 = vector.broadcast %cst_22 : f32 to vector<1x256xf32>
    %42 = arith.mulf %41, %34 : vector<1x256xf32>
    %43 = math.exp %42 : vector<1x256xf32>
    %44 = arith.mulf %40, %43 : vector<1x256xf32>
    %c0_23 = arith.constant 0 : index
    %c0_24 = arith.constant 0 : index
    %45 = vector.load %arg9[%c0_23, %c0_24] : memref<1x256xf32, #tpu.memory_space<vmem>>, vector<1x256xf32>
    tpu.vector_store %arg9[%c0_23, %c0_24], %44 {strides = array<i32>} : memref<1x256xf32, #tpu.memory_space<vmem>>, vector<1x256xf32>,
    return
  }
  func.func @transform_0(%arg0: i32) -> (i32, i32) {
    %c0_i32 = arith.constant 0 : i32
    %c0_i32_0 = arith.constant 0 : i32
    return %c0_i32, %arg0 : i32, i32
  }
  func.func @transform_1(%arg0: i32) -> (i32, i32) {
    %c0_i32 = arith.constant 0 : i32
    %c0_i32_0 = arith.constant 0 : i32
    return %c0_i32, %arg0 : i32, i32
  }
  func.func @transform_2(%arg0: i32) -> (i32, i32) {
    %c0_i32 = arith.constant 0 : i32
    %c0_i32_0 = arith.constant 0 : i32
    %c0_i32_1 = arith.constant 0 : i32
    return %c0_i32, %c0_i32_0 : i32, i32
  }
  func.func @transform_3(%arg0: i32) -> (i32, i32) {
    %c0_i32 = arith.constant 0 : i32
    %c0_i32_0 = arith.constant 0 : i32
    %c0_i32_1 = arith.constant 0 : i32
    return %c0_i32, %c0_i32_0 : i32, i32
  }
  func.func @transform_4(%arg0: i32) -> (i32, i32) {
    %c0_i32 = arith.constant 0 : i32
    %c0_i32_0 = arith.constant 0 : i32
    %c0_i32_1 = arith.constant 0 : i32
    return %c0_i32, %c0_i32_0 : i32, i32
  }
  func.func @transform_5(%arg0: i32) -> (i32, i32) {
    %c0_i32 = arith.constant 0 : i32
    %c0_i32_0 = arith.constant 0 : i32
    %c0_i32_1 = arith.constant 0 : i32
    return %c0_i32, %c0_i32_0 : i32, i32
  }
  func.func @transform_6(%arg0: i32) -> (i32, i32) {
    %c0_i32 = arith.constant 0 : i32
    %c0_i32_0 = arith.constant 0 : i32
    %c0_i32_1 = arith.constant 0 : i32
    return %c0_i32, %c0_i32_0 : i32, i32
  }
  func.func @transform_7(%arg0: i32) -> (i32, i32) {
    %c0_i32 = arith.constant 0 : i32
    %c0_i32_0 = arith.constant 0 : i32
    %c0_i32_1 = arith.constant 0 : i32
    return %c0_i32, %c0_i32_0 : i32, i32
  }
  func.func @transform_8(%arg0: i32) -> (i32, i32) {
    %c0_i32 = arith.constant 0 : i32
    %c0_i32_0 = arith.constant 0 : i32
    return %c0_i32, %arg0 : i32, i32
  }
}

</mosaic_0001>

<bundles_post_ra>
// kernel: pg_forward.1
= control target key start
LH: loop header
LB: loop body
LE: loop exit
PB: predicated region body
PF: predicated region fallthrough
CT: control target
= control target key end

     0   :  { %13 = vsyncpa [#allocation3], 0  ;;  %s1570_s0 = inlined_call_operand.vmem [shape: f32[8,512], index: 0, kind: input, shape index: {}]   ;;  %s1571_s1 = inlined_call_operand.vmem [shape: f32[2,512], index: 1, kind: input, shape index: {}]   ;;  %s1572_s2 = inlined_call_operand.vmem [shape: bf16[128,8], index: 2, kind: input, shape index: {}]   ;;  %s1573_s3 = inlined_call_operand.vmem [shape: f32[128,1], index: 3, kind: input, shape index: {}]   ;;  %s1574_s4 = inlined_call_operand.vmem [shape: bf16[64,128], index: 4, kind: input, shape index: {}]   ;;  %s1575_s5 = inlined_call_operand.vmem [shape: f32[64,1], index: 5, kind: input, shape index: {}]   ;;  %s1576_s6 = inlined_call_operand.vmem [shape: bf16[2,64], index: 6, kind: input, shape index: {}]   ;;  %s1577_s7 = inlined_call_operand.vmem [shape: f32[2,1], index: 7, kind: input, shape index: {}]   ;;  %s1578_s8 = inlined_call_operand.hbm [shape: f32[1,512], index: 8, kind: output, shape index: {}]  }
   0x1   :  { %15 = vsyncpa [#allocation3 + $0x1], 0  ;;  %s1265_s27 = smov 0   ;;  %s1267_s28 = smov 0  }
   0x2   :  { %s1269_s29 = smov 0   ;;  %s1271_s30 = smov 0  }
   0x3 LB: > { %s1286_s9 = sadd.s32 4294967295, %s1215_s30   ;;  %s1056_s10 = sadd.s32 4294967294, %s1215_s30   ;;  %s1215_s30 = sphi %s1271_s30, %s1584_s30   ;;  %s1211_s29 = sphi %s1269_s29, %s1583_s29   ;;  %s1207_s28 = sphi %s1267_s28, %s1582_s28   ;;  %s1203_s27 = sphi %s1265_s27, %s1581_s27  }
   0x4   : > { %s1290_s11 = sadd.s32 1, %s1215_s30   ;;  %s206_s12 = sadd.s32 1, %s1211_s29 }
   0x5   : > { %s203_s13 = ssub.s32 %s1215_s30, %s1290_s11  ;;  %p216_p0 = scmp.ne.s32.totalorder %s1211_s29, %s1207_s28 }
   0x6   : > { %p204_p1 = scmp.eq.s32.totalorder %s203_s13, 0  ;;  %p217_p2 = scmp.eq.s32.totalorder %s1286_s9, 1 }
   0x7   : > { %p222_p3 = scmp.ne.s32.totalorder %s1207_s28, %s1203_s27  ;;  %p223_p4 = scmp.eq.s32.totalorder %s1056_s10, 1 }
   0x8   : > { %s1301_s14 = scalar_select %p204_p1, %s1211_s29, %s206_s12  }
   0x9   : > { %p1303_p5 = por %p217_p2, %p216_p0  ;;  %p1307_p6 = por %p223_p4, %p222_p3 }
   0xa   : > { %p1059_p7 = scmp.ge.s32.totalorder %s1215_s30, 1  ;;  %p277_p8 = scmp.lt.s32.totalorder %s1215_s30, 3 }
   0xc   : > { %p278_p9 = pnand %p1059_p7, %p277_p8 }
   0xd   : > { %s1061_s17 = sshll.u32 (!%p278_p9), %s1286_s9, 1  ;;  %s1093_s19 = sshll.u32 (!%p278_p9), %s1286_s9, 5 }
   0xe   : > { %281 = sbr.rel (%p278_p9) target bundleno = 809 (0x329), region = 52  ;;  %p317_p10 = scmp.lt.s32.totalorder (!%p278_p9), %s1061_s17, 3 }
   0xf   : > { %s983_s24 = scalar_lea.hbm (!%p278_p9), %s1578_s8, %s1093_s19  ;;  %s1219_s10 = smov (!%p278_p9), [#allocation2]  }
  0x10   : > { %s1159_s12 = sshll.u32 (!%p278_p9), %s1219_s10, 4  ;;  %s1160_s12 = int_to_ptr.vmem [resolvable:$false] %s1159_s12 }
  0x11   : > { %s1161_s9 = scalar_lea.vmem (!%p278_p9), %s1160_s12, 64 }
  0x13   : > { %v1217_v0 = vmov 0   ;;  %s1586_s17 = smov (!%p317_p10, %s1061_s17), 3  ;;  %v364_v1 = vld [vmem:[%s1573_s3 + $0x70] sm:$0xff]  ;;  %vm511_vm0 = vcmask 1043456   ;;  %v365_v6 = vld [vmem:[%s1573_s3 + $0x78] sm:$0xff]  ;;  %v362_v7 = vld [vmem:[%s1573_s3 + $0x60] sm:$0xff] }
  0x14   : > { %550 = vmatprep.mubr.bf16.mxu0 %v1217_v0  ;;  %1135 = vset.pattern.permute.xlu0 %v1217_v0  ;;  %s1062_s18 = sshll.u32 %s1586_s17, 3  ;;  %v1137_v9 = vld [vmem:[%s1572_s2] sm:$0xff]   ;;  %v363_v10 = vld [vmem:[%s1573_s3 + $0x68] sm:$0xff]  ;;  %vm486_vm1 = vcmask 64512   ;;  %v360_v11 = vld [vmem:[%s1573_s3 + $0x50] sm:$0xff]  ;;  %vm863_vm2 = vcmask 523264  }
  0x15   : > { %1136 = vset.pattern.permute.xlu1 %v1217_v0  ;;  %791 = vmatprep.mubr.bf16.mxu1 %v1217_v0  ;;  %s320_s21 = scalar_lea.vmem %s1570_s0, %s1062_s18  ;;  %v361_v12 = vld [vmem:[%s1573_s3 + $0x58] sm:$0xff]  ;;  %v358_v13 = vld [vmem:[%s1573_s3 + $0x40] sm:$0xff]  ;;  %v1138_v14 = vld [vmem:[%s1572_s2 + $0x8] sm:$0xff]   ;;  %s1064_s26 = sshll.u32 %s1586_s17, 1 }
  0x16   : > { %v331_v2 = vld [vmem:[%s320_s21 + $0x8] sm:$0xff]  ;;  %v330_v3 = vld [vmem:[%s320_s21] sm:$0xff]  ;;  %438 = vperm.xlu0 %1135, %v364_v1   ;;  %428 = vperm.xlu1 %1136, %v362_v7   ;;  %v356_v16 = vld [vmem:[%s1573_s3 + $0x30] sm:$0xff]  ;;  %s326_s13 = scalar_lea.vmem %s1571_s1, %s1064_s26  ;;  %s313_s17 = sand.u32 1, %s1207_s28  }
  0x17   : > { %v333_v4 = vpack.c.bf16 %v331_v2, %v331_v2  ;;  %v332_v5 = vpack.c.bf16 %v330_v3, %v330_v3  ;;  %v359_v15 = vld [vmem:[%s1573_s3 + $0x48] sm:$0xff]  ;;  %v357_v17 = vld [vmem:[%s1573_s3 + $0x38] sm:$0xff]  ;;  %v354_v18 = vld [vmem:[%s1573_s3 + $0x20] sm:$0xff]  ;;  %s1060_s18 = sshll.u32 %s313_s17, 1  ;;  %s971_s25 = scalar_lea.sflag [#allocation3], %s313_s17 }
  0x18   : > { %v1139_v19 = vld [vmem:[%s1572_s2 + $0x10] sm:$0xff]   ;;  %v355_v20 = vld [vmem:[%s1573_s3 + $0x28] sm:$0xff]  ;;  %v353_v22 = vld [vmem:[%s1573_s3 + $0x18] sm:$0xff]  ;;  %s315_s20 = scalar_lea.vmem [#allocation2], %s1060_s18 }
  0x19   : > { %1073 = vmatprep.subr.msk.bf16.mxu0 %vm511_vm0, %v333_v4  ;;  %v513_v8 = vsel %vm511_vm0, %v332_v5, 0  ;;  %v352_v21 = vld [vmem:[%s1573_s3 + $0x10] sm:$0xff]  ;;  %v350_v23 = vld [vmem:[%s1573_s3] sm:$0xff]  ;;  %v1140_v24 = vld [vmem:[%s1572_s2 + $0x18] sm:$0xff]   ;;  %s985_s21 = sshll.u32 %s315_s20, 4  ;;  %s986_s21 = int_to_ptr.vmem [resolvable:$true] %s985_s21 }
  0x1a   : > { %533 = vmatpush1.bf16.msra.mxu0 %v513_v8  ;;  %443 = vperm.xlu0 %1135, %v365_v6   ;;  %v351_v25 = vld [vmem:[%s1573_s3 + $0x8] sm:$0xff]  ;;  %v693_v26 = vld [vmem:[%s1575_s5 + $0x30] sm:$0xff]  ;;  %v694_v27 = vld [vmem:[%s1575_s5 + $0x38] sm:$0xff]  ;;  %s1155_s26 = scalar_lea.vmem %s986_s21, 32  ;;  %p1162_p0 = scmp.lt.s32.totalorder %s986_s21, %s1160_s12 }
  0x1b   : > { %433 = vperm.xlu1 %1136, %v363_v10   ;;  %v691_v28 = vld [vmem:[%s1575_s5 + $0x20] sm:$0xff]  ;;  %v692_v30 = vld [vmem:[%s1575_s5 + $0x28] sm:$0xff]  ;;  %v689_v31 = vld [vmem:[%s1575_s5 + $0x10] sm:$0xff]  ;;  %p1156_p11 = scmp.ne.s32.totalorder %s986_s21, %s1155_s26  ;;  %p1163_p1 = scmp.lt.s32.totalorder %s1161_s9, %s1155_s26 }
  0x1c   : > { %v1141_v29 = vld [vmem:[%s1572_s2 + $0x20] sm:$0xff]   ;;  %v690_v32 = vld [vmem:[%s1575_s5 + $0x18] sm:$0xff]  ;;  %v1142_v34 = vld [vmem:[%s1572_s2 + $0x28] sm:$0xff]  }
  0x1d   : > { %1074 = vmatmul.mubr.msk.bf16.vlgmr.msra.gmra.mxu0 %vm486_vm1, %v1137_v9  ;;  %v687_v33 = vld [vmem:[%s1575_s5] sm:$0xff]  ;;  %v688_v35 = vld [vmem:[%s1575_s5 + $0x8] sm:$0xff]  ;;  %v1143_v37 = vld [vmem:[%s1572_s2 + $0x30] sm:$0xff]   ;;  %p1157_p12 = pnand %p1156_p11, %p1303_p5  ;;  %p1164_p2 = por %p1163_p1, %p1162_p0 }
  0x1e   : > { %560 = vmatprep.mubr.bf16.mxu0 %v1217_v0  ;;  %418 = vperm.xlu0 %1135, %v360_v11   ;;  %v857_v36 = vld [vmem:[%s1577_s7] sm:$0x3]  ;;  %v1144_v38 = vld [vmem:[%s1572_s2 + $0x38] sm:$0xff]  }
  0x1f   : > { %423 = vperm.xlu1 %1136, %v361_v12   ;;  %p1158_p13 = pneg %p1157_p12 }
  0x21   : > { %p1165_p3 = pnand %p1164_p2, %p1158_p13 }
  0x22   : > { %408 = vperm.xlu0 %1135, %v358_v13  }
  0x23   : > { %413 = vperm.xlu1 %1136, %v359_v15  }
  0x25   : > { %1075 = vmatmul.mubr.msk.bf16.gmra.mxu0 %vm486_vm1, %v1138_v14 }
  0x26   : > { %570 = vmatprep.mubr.bf16.mxu0 %v1217_v0  ;;  %398 = vperm.xlu0 %1135, %v356_v16  }
  0x27   : > { %403 = vperm.xlu1 %1136, %v357_v17  }
  0x2a   : > { %388 = vperm.xlu0 %1135, %v354_v18  }
  0x2b   : > { %393 = vperm.xlu1 %1136, %v355_v20  }
  0x2d   : > { %1076 = vmatmul.mubr.msk.bf16.gmra.mxu0 %vm486_vm1, %v1139_v19 }
  0x2e   : > { %580 = vmatprep.mubr.bf16.mxu0 %v1217_v0  ;;  %378 = vperm.xlu0 %1135, %v352_v21  }
  0x2f   : > { %383 = vperm.xlu1 %1136, %v353_v22  }
  0x32   : > { %368 = vperm.xlu0 %1135, %v350_v23  }
  0x33   : > { %373 = vperm.xlu1 %1136, %v351_v25  }
  0x35   : > { %1077 = vmatmul.mubr.msk.bf16.gmra.mxu0 %vm486_vm1, %v1140_v24 }
  0x36   : > { %590 = vmatprep.mubr.bf16.mxu0 %v1217_v0  ;;  %727 = vperm.xlu0 %1135, %v693_v26  }
  0x37   : > { %732 = vperm.xlu1 %1136, %v694_v27  }
  0x3a   : > { %717 = vperm.xlu0 %1135, %v691_v28  }
  0x3b   : > { %722 = vperm.xlu1 %1136, %v692_v30  }
  0x3d   : > { %1078 = vmatmul.mubr.msk.bf16.gmra.mxu0 %vm486_vm1, %v1141_v29 }
  0x3e   : > { %600 = vmatprep.mubr.bf16.mxu0 %v1217_v0  ;;  %707 = vperm.xlu0 %1135, %v689_v31  }
  0x3f   : > { %712 = vperm.xlu1 %1136, %v690_v32  }
  0x42   : > { %697 = vperm.xlu0 %1135, %v687_v33  }
  0x43   : > { %702 = vperm.xlu1 %1136, %v688_v35  }
  0x45   : > { %1079 = vmatmul.mubr.msk.bf16.gmra.mxu0 %vm486_vm1, %v1142_v34 }
  0x46   : > { %610 = vmatprep.mubr.bf16.mxu0 %v1217_v0  ;;  %860 = vperm.xlu0 %1135, %v857_v36  }
  0x4d   : > { %1080 = vmatmul.mubr.msk.bf16.gmra.mxu0 %vm486_vm1, %v1143_v37 }
  0x4e   : > { %620 = vmatprep.mubr.bf16.mxu0 %v1217_v0 }
  0x55   : > { %1081 = vmatmul.mubr.msk.bf16.gmra.mxu0 %vm486_vm1, %v1144_v38 }
  0x91   : > { %v1438_v39 = vpop.permute.xlu0 %438  ;;  %v1440_v40 = vpop.permute.xlu1 %428 }
  0x95   : > { %v1442_v41 = vpop.permute.xlu0 %443 }
  0x96   : > { %v1444_v42 = vpop.permute.xlu1 %433 }
  0x99   : > { %v1446_v43 = vpop.permute.xlu0 %418 }
  0x9a   : > { %v1448_v44 = vpop.permute.xlu1 %423 }
  0x9d   : > { %v1450_v45 = vpop.permute.xlu0 %408 }
  0x9e   : > { %v1452_v46 = vpop.permute.xlu1 %413 }
  0xa1   : > { %v1454_v47 = vpop.permute.xlu0 %398 }
  0xa2   : > { %v1456_v48 = vpop.permute.xlu1 %403 }
  0xa5   : > { %v1458_v49 = vpop.permute.xlu0 %388 }
  0xa6   : > { %v1460_v50 = vpop.permute.xlu1 %393 }
  0xa9   : > { %v379_v51 = vpop.permute.xlu0 %378 }
  0xaa   : > { %v384_v52 = vpop.permute.xlu1 %383 }
  0xad   : > { %v369_v53 = vpop.permute.xlu0 %368 }
  0xae   : > { %v374_v56 = vpop.permute.xlu1 %373 }
  0xdd   : > { %v552_v54 = vpop.f32.mrf.mxu0 }
  0xde   : > { %v553_v57 = vadd.f32 %v552_v54, %v369_v53 }
  0xdf   : > { %v554_v55 = vpop.f32.mrf.mxu0 }
  0xe0   : > { %v555_v59 = vadd.f32 %v554_v55, %v369_v53  ;;  %v631_v62 = vmax.f32 %v553_v57, 0.0 }
  0xe1   : > { %v556_v58 = vpop.f32.mrf.mxu0 }
  0xe2   : > { %v557_v60 = vadd.f32 %v556_v58, %v374_v56  ;;  %v632_v3 = vmax.f32 %v555_v59, 0.0 }
  0xe3   : > { %v558_v61 = vpop.f32.mrf.mxu0 }
  0xe4   : > { %v633_v63 = vmax.f32 %v557_v60, 0.0  ;;  %v559_v1 = vadd.f32 %v558_v61, %v374_v56 }
  0xe5   : > { %v562_v2 = vpop.f32.mrf.mxu0 }
  0xe6   : > { %v1462_v4 = vpack.c.bf16 %v633_v63, %v631_v62  ;;  %v634_v5 = vmax.f32 %v559_v1, 0.0  ;;  %v563_v8 = vadd.f32 %v562_v2, %v379_v51 }
  0xe7   : > { %v564_v6 = vpop.f32.mrf.mxu0 }
  0xe8   : > { %v1464_v7 = vpack.c.bf16 %v634_v5, %v632_v3  ;;  %v565_v10 = vadd.f32 %v564_v6, %v379_v51  ;;  %v635_v13 = vmax.f32 %v563_v8, 0.0 }
  0xe9   : > { %v566_v9 = vpop.f32.mrf.mxu0 }
  0xea   : > { %v567_v11 = vadd.f32 %v566_v9, %v384_v52  ;;  %v636_v17 = vmax.f32 %v565_v10, 0.0 }
  0xeb   : > { %v568_v12 = vpop.f32.mrf.mxu0 }
  0xec   : > { %v637_v14 = vmax.f32 %v567_v11, 0.0  ;;  %v569_v15 = vadd.f32 %v568_v12, %v384_v52 }
  0xed   : > { %v1466_v16 = vpop.f32.mrf.mxu0 }
  0xee   : > { %v1468_v18 = vpack.c.bf16 %v637_v14, %v635_v13  ;;  %v638_v19 = vmax.f32 %v569_v15, 0.0 }
  0xef   : > { %v1470_v20 = vpop.f32.mrf.mxu0 }
  0xf0   : > { %v1472_v21 = vpack.c.bf16 %v638_v19, %v636_v17 }
  0xf1   : > { %v1474_v22 = vpop.f32.mrf.mxu0 }
  0xf3   : > { %v1476_v23 = vpop.f32.mrf.mxu0 }
  0xf5   : > { %v1478_v24 = vpop.f32.mrf.mxu0 }
  0xf7   : > { %v584_v25 = vpop.f32.mrf.mxu0 }
  0xf9   : > { %v586_v26 = vpop.f32.mrf.mxu0 }
  0xfb   : > { %v588_v27 = vpop.f32.mrf.mxu0 }
  0xfd   : > { %v592_v28 = vpop.f32.mrf.mxu0 }
  0xff   : > { %v594_v29 = vpop.f32.mrf.mxu0 }
 0x101   : > { %v596_v30 = vpop.f32.mrf.mxu0 }
 0x103   : > { %v598_v31 = vpop.f32.mrf.mxu0 }
 0x105   : > { %v602_v32 = vpop.f32.mrf.mxu0 }
 0x106   : > { %v603_v15 = vadd.f32 %v602_v32, %v1446_v43 }
 0x107   : > { %v604_v33 = vpop.f32.mrf.mxu0 }
 0x108   : > { %v605_v9 = vadd.f32 %v604_v33, %v1446_v43  ;;  %v597_v33 = vadd.f32 %v596_v30, %v1452_v46  ;;  %v585_v43 = vadd.f32 %v584_v25, %v1454_v47 }
 0x109   : > { %v606_v34 = vpop.f32.mrf.mxu0 }
 0x10a   : > { %v607_v11 = vadd.f32 %v606_v34, %v1448_v44  ;;  %v652_v19 = vmax.f32 %v605_v9, 0.0  ;;  %v644_v25 = vmax.f32 %v585_v43, 0.0 }
 0x10b   : > { %v608_v35 = vpop.f32.mrf.mxu0 }
 0x10c   : > { %v609_v1 = vadd.f32 %v608_v35, %v1448_v44  ;;  %v653_v35 = vmax.f32 %v607_v11, 0.0  ;;  %v589_v44 = vadd.f32 %v588_v27, %v1456_v48  ;;  %v583_v27 = vadd.f32 %v1478_v24, %v1454_v47 }
 0x10d   : > { %v612_v36 = vpop.f32.mrf.mxu0 }
 0x10e   : > { %v613_v6 = vadd.f32 %v612_v36, %v1440_v40  ;;  %v646_v30 = vmax.f32 %v589_v44, 0.0 }
 0x10f   : > { %v614_v37 = vpop.f32.mrf.mxu0 }
 0x110   : > { %v615_v60 = vadd.f32 %v614_v37, %v1440_v40  ;;  %v655_v17 = vmax.f32 %v613_v6, 0.0  ;;  %v595_v40 = vadd.f32 %v594_v29, %v1450_v45  ;;  %v587_v29 = vadd.f32 %v586_v26, %v1456_v48  ;;  %v728_v6 = vpop.permute.xlu0 %727 }
 0x111   : > { %v616_v38 = vpop.f32.mrf.mxu0  ;;  %v577_v48 = vadd.f32 %v1474_v22, %v1460_v50 }
 0x112   : > { %v617_v62 = vadd.f32 %v616_v38, %v1444_v42  ;;  %v656_v10 = vmax.f32 %v615_v60, 0.0  ;;  %v651_v38 = vmax.f32 %v603_v15, 0.0  ;;  %v648_v32 = vmax.f32 %v595_v40, 0.0 }
 0x113   : > { %v618_v51 = vpop.f32.mrf.mxu0  ;;  %v645_v26 = vmax.f32 %v587_v29, 0.0  ;;  %v641_v24 = vmax.f32 %v577_v48, 0.0 }
 0x114   : > { %v619_v55 = vadd.f32 %v618_v51, %v1444_v42  ;;  %v657_v12 = vmax.f32 %v617_v62, 0.0  ;;  %v654_v42 = vmax.f32 %v609_v1, 0.0  ;;  %v649_v51 = vmax.f32 %v597_v33, 0.0  ;;  %v718_v11 = vpop.permute.xlu0 %717 }
 0x115   : > { %v622_v52 = vpop.f32.mrf.mxu0 }
 0x116   : > { %v623_v58 = vadd.f32 %v622_v52, %v1438_v39  ;;  %v658_v2 = vmax.f32 %v619_v55, 0.0  ;;  %v683_v36 = vpack.c.bf16 %v657_v12, %v655_v17  ;;  %v682_v37 = vpack.c.bf16 %v654_v42, %v652_v19 }
 0x117   : > { %v624_v53 = vpop.f32.mrf.mxu0  ;;  %v681_v52 = vpack.c.bf16 %v653_v35, %v651_v38 }
 0x118   : > { %v625_v56 = vadd.f32 %v624_v53, %v1438_v39  ;;  %v659_v8 = vmax.f32 %v623_v58, 0.0  ;;  %v684_v14 = vpack.c.bf16 %v658_v2, %v656_v10  ;;  %v708_v33 = vpop.permute.xlu0 %707 }
 0x119   : > { %v626_v54 = vpop.f32.mrf.mxu0 }
 0x11a   : > { %v627_v57 = vadd.f32 %v626_v54, %v1442_v41  ;;  %v660_v3 = vmax.f32 %v625_v56, 0.0  ;;  %v678_v56 = vpack.c.bf16 %v646_v30, %v644_v25 }
 0x11b   : > { %v628_v59 = vpop.f32.mrf.mxu0 }
 0x11c   : > { %v629_v61 = vadd.f32 %v628_v59, %v1442_v41  ;;  %v661_v63 = vmax.f32 %v627_v57, 0.0  ;;  %v599_v41 = vadd.f32 %v598_v31, %v1452_v46  ;;  %v593_v31 = vadd.f32 %v592_v28, %v1450_v45  ;;  %v698_v25 = vpop.permute.xlu0 %697 }
 0x11d   : > { %v579_v46 = vadd.f32 %v1476_v23, %v1460_v50  ;;  %v575_v45 = vadd.f32 %v1470_v20, %v1458_v49  ;;  %v573_v23 = vadd.f32 %v1466_v16, %v1458_v49  ;;  %v643_v57 = vmax.f32 %v583_v27, 0.0  ;;  %v1145_v49 = vld [vmem:[%s1574_s4] sm:$0xff]   ;;  %v1146_v50 = vld [vmem:[%s1574_s4 + $0x8] sm:$0xff]  }
 0x11e   : > { %v662_v5 = vmax.f32 %v629_v61, 0.0  ;;  %v685_v13 = vpack.c.bf16 %v661_v63, %v659_v8  ;;  %v650_v34 = vmax.f32 %v599_v41, 0.0  ;;  %v647_v54 = vmax.f32 %v593_v31, 0.0 }
 0x11f   : > { %v642_v55 = vmax.f32 %v579_v46, 0.0  ;;  %v640_v47 = vmax.f32 %v575_v45, 0.0  ;;  %v677_v58 = vpack.c.bf16 %v645_v26, %v643_v57  ;;  %v639_v20 = vmax.f32 %v573_v23, 0.0 }
 0x120   : > { %v686_v39 = vpack.c.bf16 %v662_v5, %v660_v3  ;;  %v680_v53 = vpack.c.bf16 %v650_v34, %v648_v32  ;;  %v679_v28 = vpack.c.bf16 %v649_v51, %v647_v54  ;;  %v733_v3 = vpop.permute.xlu1 %732 }
 0x121   : > { %v676_v59 = vpack.c.bf16 %v642_v55, %v640_v47  ;;  %v675_v60 = vpack.c.bf16 %v641_v24, %v639_v20 }
 0x122   : > { %759 = vmatprep.subr.bf16.mxu1 %v686_v39 }
 0x123   : > { %760 = vmatpush1.bf16.msra.mxu1 %v685_v13 }
 0x124   : > { %761 = vmatprep.subr.bf16.mxu1 %v684_v14  ;;  %v723_v10 = vpop.permute.xlu1 %722 }
 0x127   : > { %762 = vmatpush1.bf16.msra.mxu1 %v683_v36 }
 0x128   : > { %763 = vmatprep.subr.bf16.mxu1 %v682_v37  ;;  %v713_v14 = vpop.permute.xlu1 %712 }
 0x12b   : > { %764 = vmatpush1.bf16.msra.mxu1 %v681_v52 }
 0x12c   : > { %765 = vmatprep.subr.bf16.mxu1 %v680_v53  ;;  %v703_v52 = vpop.permute.xlu1 %702 }
 0x12f   : > { %766 = vmatpush1.bf16.msra.mxu1 %v679_v28 }
 0x130   : > { %767 = vmatprep.subr.bf16.mxu1 %v678_v56 }
 0x133   : > { %768 = vmatpush1.bf16.msra.mxu1 %v677_v58 }
 0x134   : > { %769 = vmatprep.subr.bf16.mxu1 %v676_v59 }
 0x137   : > { %770 = vmatpush1.bf16.msra.mxu1 %v675_v60 }
 0x138   : > { %771 = vmatprep.subr.bf16.mxu1 %v1472_v21 }
 0x13b   : > { %772 = vmatpush1.bf16.msra.mxu1 %v1468_v18 }
 0x13c   : > { %773 = vmatprep.subr.bf16.mxu1 %v1464_v7  ;;  %v1147_v7 = vld [vmem:[%s1574_s4 + $0x10] sm:$0xff]  }
 0x13f   : > { %774 = vmatpush1.bf16.msra.mxu1 %v1462_v4  ;;  %v1148_v4 = vld [vmem:[%s1574_s4 + $0x18] sm:$0xff]  }
 0x142   : > { %792 = vmatmul.mubr.bf16.vlgmr.msra.gmra.mxu1 %v1145_v49 }
 0x143   : > { %801 = vmatprep.mubr.bf16.mxu1 %v1217_v0 }
 0x14a   : > { %802 = vmatmul.mubr.bf16.gmra.mxu1 %v1146_v50 }
 0x14b   : > { %811 = vmatprep.mubr.bf16.mxu1 %v1217_v0 }
 0x152   : > { %812 = vmatmul.mubr.bf16.gmra.mxu1 %v1147_v7 }
 0x153   : > { %821 = vmatprep.mubr.bf16.mxu1 %v1217_v0 }
 0x15a   : > { %822 = vmatmul.mubr.bf16.gmra.mxu1 %v1148_v4 }
 0x15b   : > { %899 = vmatprep.mubr.bf16.mxu1 %v1217_v0 }
 0x202   : > { %v793_v16 = vpop.f32.mrf.mxu1 }
 0x203   : > { %v794_v58 = vadd.f32 %v793_v16, %v698_v25  ;;  %v912_v16 = vld [vmem:[%s326_s13] sm:$0xf] }
 0x204   : > { %v795_v18 = vpop.f32.mrf.mxu1 }
 0x205   : > { %v796_v28 = vadd.f32 %v795_v18, %v698_v25  ;;  %v832_v7 = vmax.f32 %v794_v58, 0.0  ;;  %v848_v18 = vld [vmem:[%s1576_s6] sm:$0x1] }
 0x206   : > { %v797_v21 = vpop.f32.mrf.mxu1 }
 0x207   : > { %v798_v56 = vadd.f32 %v797_v21, %v703_v52  ;;  %v833_v20 = vmax.f32 %v796_v28, 0.0  ;;  %v913_v21 = vmul.f32 %v912_v16, %v912_v16 }
 0x208   : > { %v799_v22 = vpop.f32.mrf.mxu1 }
 0x209   : > { %v800_v27 = vadd.f32 %v799_v22, %v703_v52  ;;  %v834_v60 = vmax.f32 %v798_v56, 0.0  ;;  %v1087_v22 = vrot.slane %v913_v21, 9 }
 0x20a   : > { %v803_v61 = vpop.f32.mrf.mxu1 }
 0x20b   : > { %v804_v48 = vadd.f32 %v803_v61, %v708_v33  ;;  %v835_v47 = vmax.f32 %v800_v27, 0.0  ;;  %v849_v4 = vpack.c.bf16 %v834_v60, %v832_v7  ;;  %v918_v61 = vadd.f32 %v1087_v22, %v913_v21 }
 0x20c   : > { %v805_v62 = vpop.f32.mrf.mxu1 }
 0x20d   : > { %v806_v32 = vadd.f32 %v805_v62, %v708_v33  ;;  %v836_v59 = vmax.f32 %v804_v48, 0.0  ;;  %v850_v50 = vpack.c.bf16 %v835_v47, %v833_v20  ;;  %v861_v62 = vpop.permute.xlu0 %860 }
 0x20e   : > { %v807_v63 = vpop.f32.mrf.mxu1 }
 0x20f   : > { %v808_v46 = vadd.f32 %v807_v63, %v713_v14  ;;  %v837_v55 = vmax.f32 %v806_v32, 0.0 }
 0x210   : > { %v809_v1 = vpop.f32.mrf.mxu1 }
 0x211   : > { %v810_v44 = vadd.f32 %v809_v1, %v713_v14  ;;  %v838_v23 = vmax.f32 %v808_v46, 0.0  ;;  %v931_v1 = vmul.f32 -0.5, %v918_v61  ;;  %v935_v14 = vlaneseq }
 0x212   : > { %v813_v2 = vpop.f32.mrf.mxu1 }
 0x213   : > { %v814_v38 = vadd.f32 %v813_v2, %v718_v11  ;;  %v839_v54 = vmax.f32 %v810_v44, 0.0  ;;  %v851_v49 = vpack.c.bf16 %v838_v23, %v836_v59  ;;  %vm967_vm3 = vcmp.lt.s32.totalorder %v935_v14, 256 }
 0x214   : > { %v815_v5 = vpop.f32.mrf.mxu1 }
 0x215   : > { %v816_v40 = vadd.f32 %v815_v5, %v718_v11  ;;  %v840_v26 = vmax.f32 %v814_v38, 0.0  ;;  %v852_v24 = vpack.c.bf16 %v839_v54, %v837_v55 }
 0x216   : > { %v817_v8 = vpop.f32.mrf.mxu1 }
 0x217   : > { %v818_v35 = vadd.f32 %v817_v8, %v723_v10  ;;  %v841_v29 = vmax.f32 %v816_v40, 0.0 }
 0x218   : > { %v819_v9 = vpop.f32.mrf.mxu1 }
 0x219   : > { %v820_v0 = vadd.f32 %v819_v9, %v723_v10  ;;  %v842_v30 = vmax.f32 %v818_v35, 0.0  ;;  %v932_v9 = vmul.f32 1.442695, %v931_v1 }
 0x21a   : > { %v823_v39 = vpop.f32.mrf.mxu1 }
 0x21b   : > { %v824_v15 = vadd.f32 %v823_v39, %v728_v6  ;;  %v843_v34 = vmax.f32 %v820_v0, 0.0  ;;  %v853_v57 = vpack.c.bf16 %v842_v30, %v840_v26  ;;  %1149 = vpow2.f32 %v932_v9 }
 0x21c   : > { %v825_v12 = vpop.f32.mrf.mxu1 }
 0x21d   : > { %v826_v41 = vadd.f32 %v825_v12, %v728_v6  ;;  %v844_v43 = vmax.f32 %v824_v15, 0.0  ;;  %v854_v45 = vpack.c.bf16 %v843_v34, %v841_v29  ;;  %v936_v15 = vshrl.u32 %v935_v14, 7 }
 0x21e   : > { %v827_v13 = vpop.f32.mrf.mxu1 }
 0x21f   : > { %v828_v42 = vadd.f32 %v827_v13, %v733_v3  ;;  %v845_v37 = vmax.f32 %v826_v41, 0.0  ;;  %v941_v40 = vsub.s32 2, %v936_v15 }
 0x220   : > { %v829_v17 = vpop.f32.mrf.mxu1 }
 0x221   : > { %v830_v19 = vadd.f32 %v829_v17, %v733_v3  ;;  %v846_v36 = vmax.f32 %v828_v42, 0.0  ;;  %v937_v17 = vsub.s32 0, %v936_v15 }
 0x223   : > { %v847_v31 = vmax.f32 %v830_v19, 0.0  ;;  %v855_v53 = vpack.c.bf16 %v846_v36, %v844_v43  ;;  %v1218_v19 = vmov 1966171168  }
 0x224   : > { %v951_v33 = vunpack.c.l.s4 %v1218_v19 }
 0x225   : > { %v856_v51 = vpack.c.bf16 %v847_v31, %v845_v37 }
 0x226   : > { %v952_v31 = vunpack.c.0.s8 %v951_v33 }
 0x227   : > { %875 = vmatprep.subr.bf16.mxu1 %v856_v51 }
 0x228   : > { %876 = vmatpush1.bf16.msra.mxu1 %v855_v53  ;;  %v1150_v35 = vpop.eup %1149  ;;  %v955_v51 = vsub.s32 %v952_v31, %v936_v15 }
 0x229   : > { %877 = vmatprep.subr.bf16.mxu1 %v854_v45  ;;  %v938_v34 = vrot.slane %v1150_v35, %v937_v17  ;;  %v942_v37 = vrot.slane %v1150_v35, %v941_v40 }
 0x22c   : > { %878 = vmatpush1.bf16.msra.mxu1 %v853_v57 }
 0x22d   : > { %879 = vmatprep.subr.bf16.mxu1 %v852_v24 }
 0x230   : > { %880 = vmatpush1.bf16.msra.mxu1 %v851_v49 }
 0x231   : > { %881 = vmatprep.subr.bf16.mxu1 %v850_v50 }
 0x234   : > { %882 = vmatpush1.bf16.msra.mxu1 %v849_v4 }
 0x237   : > { %1086 = vmatmul.mubr.msk.bf16.vlgmr.msra.gmra.mxu1 %vm863_vm2, %v848_v18 }
 0x2f7   : > { %v901_v63 = vpop.f32.mrf.mxu1 }
 0x2f8   : > { %v902_v2 = vadd.f32 %v901_v63, %v861_v62 }
 0x2f9   : > { %v903_v3 = vpop.f32.mrf.mxu1 }
 0x2fa   : > { %v908_v5 = vmax.f32 %v902_v2, 0.0  ;;  %v904_v6 = vadd.f32 %v903_v3, %v861_v62 }
 0x2fb   : > { %v905_v8 = vpop.f32.mrf.mxu1 }
 0x2fc   : > { %v910_v10 = vadd.f32 0.1, %v908_v5  ;;  %v909_v39 = vmax.f32 %v904_v6, 0.0 }
 0x2fd   : > { %v906_v11 = vpop.f32.mrf.mxu1 }
 0x2fe   : > { %v921_v12 = vrot.slane %v910_v10, 1  ;;  %v911_v13 = vadd.f32 0.1, %v909_v39 }
 0x300   : > { %v925_v0 = vmul.f32 %v921_v12, %v910_v10  ;;  %v922_v41 = vrot.slane %v911_v13, 1 }
 0x302   : > { %1151 = vrsqrt.f32 %v925_v0  ;;  %v926_v42 = vmul.f32 %v922_v41, %v911_v13 }
 0x304   : > { %1153 = vrsqrt.f32 %v926_v42 }
 0x30f   : > { %v1152_v36 = vpop.eup %1151 }
 0x310   : > { %v929_v44 = vmul.f32 0.15915494, %v1152_v36 }
 0x311   : > { %v1154_v38 = vpop.eup %1153 }
 0x312   : > { %v930_v43 = vmul.f32 0.15915494, %v1154_v38  ;;  %v945_v32 = vmul.f32 %v938_v34, %v929_v44 }
 0x314   : > { %v946_v29 = vmul.f32 %v942_v37, %v930_v43 }
 0x316   : > { %v949_v52 = vcombine.low %v945_v32, %v946_v29 }
 0x318   : > { %v956_v46 = vrot.slane %v949_v52, %v955_v51 }
 0x31a   : > { %v963_v30 = vrot.slane %v956_v46, %v955_v51 }
 0x31c   : > { %969 = vst.msk [vmem:[%s315_s20] sm:$0x3] %vm967_vm3, %v963_v30 }
 0x31d   : > { %1168 = shalt.err (!%p1165_p3)
}
 0x31e   : > { %s1169_s13 = scalar_lea.hbm %s983_s24, 32  ;;  %s1173_s19 = scalar_lea.hbm %s1578_s8, 64 }
 0x31f   : > { %p1170_p4 = scmp.ne.s32.totalorder %s983_s24, %s1169_s13  ;;  %p1174_p9 = scmp.lt.s32.totalorder %s983_s24, %s1578_s8 }
 0x320   : > { %p1175_p10 = scmp.lt.s32.totalorder %s1173_s19, %s1169_s13 }
 0x321   : > { %p1171_p7 = pnand %p1170_p4, %p1303_p5 }
 0x322   : > { %p1176_p11 = por %p1175_p10, %p1174_p9 }
 0x323   : > { %p1172_p8 = pneg %p1171_p7 }
 0x325   : > { %p1177_p12 = pnand %p1176_p11, %p1172_p8 }
 0x327   : > { %1180 = shalt.err (!%p1177_p12)
}
 0x328   : > { %1094 = dma.vmem_to_hbm [thread:$0]  (%p1303_p5), %s986_s21, 32, %s983_s24, %s971_s25  }
 0x329 PF: > { %p1100_p13 = scmp.ge.s32.totalorder %s1215_s30, 2  ;;  %s997_s23 = sand.u32 1, %s1203_s27  }
 0x32a   : > { %s998_s26 = scalar_lea.sflag [#allocation3], %s997_s23 }
 0x32b   : > { %p1097_p0 = pnand %p1100_p13, %p1307_p6 }
 0x32d   : > { %p1098_p1 = pneg %p1097_p0 }
 0x32f   : > { %1198 = dma.done.wait (%p1098_p1), %s998_s26, 32  }
 0x330   : > { %1200 = vsyncadd (%p1098_p1), %s998_s26, 4294967264  ;;  %p18_p2 = scmp.ge.s32.totalorder %s1290_s11, 4   ;;  %s1581_s27 = smov %s1207_s28 }
 0x331   : > { %s1582_s28 = smov %s1211_s29  ;;  %s1583_s29 = smov %s1301_s14 }
 0x332   : > { %s1584_s30 = smov %s1290_s11  ;;  %20 = sbr.rel (!%p18_p2) target bundleno = 3 (0x3), region = 90 }
 0x337   :  { %1003 = vsyncpa [#allocation3], 1 }
 0x338   :  { %1005 = vsyncpa [#allocation3 + $0x1], 1 }

</bundles_post_ra>
